<compile_context>
chip_gen: v7x
topology: tpu7x:2x2x1
jax: 0.10.0
libtpu: 0.0.40
codegen_flags: <defaults>
</compile_context>

<pallas_src>
import functools

import jax
import jax.numpy as jnp
from jax import lax
from jax.experimental import pallas as pl
from jax.experimental.pallas import tpu as pltpu

_LANE = 128
_NEG_SLOPE = 0.2


def _round_up(x, m):
    return ((x + m - 1) // m) * m


def attribute_filter_kernel(x_ref, w_ref, b_ref, o_ref, *, layer_dims):
    """Fused folded-5-layer MLP on one batch tile.

    x_ref: (bt, D)     f32  -- original row-major layout, batch on sublanes.
    w_ref: (L, 2D, 2D) bf16 -- per-layer weights zero-padded to (2D, 2D).
    b_ref: (L, 2D, 1)  f32  -- per-layer biases zero-padded to (2D, 1).
    o_ref: (D, bt)     f32  -- lane-dense output (batch on lanes).
    """
    out0, in0, _ = layer_dims[0]
    x = x_ref[...].astype(jnp.bfloat16)                      # (bt, D)

    # Layer 1 as W1 @ x^T via an A @ B^T contraction: no explicit XLU
    # transpose, result (out0, bt) is already lane-dense.
    h = lax.dot_general(
        w_ref[0][:out0, :in0], x,
        dimension_numbers=(((1,), (1,)), ((), ())),
        preferred_element_type=jnp.float32,
    ) + b_ref[0][:out0, :]
    h = jnp.where(h > 0, h, _NEG_SLOPE * h)

    for l in range(1, len(layer_dims)):
        out, fin, leaky = layer_dims[l]
        y = jnp.dot(
            w_ref[l][:out, :fin], h.astype(jnp.bfloat16),
            preferred_element_type=jnp.float32,
        ) + b_ref[l][:out, :]
        h = jnp.where(y > 0, y, _NEG_SLOPE * y) if leaky else y

    o_ref[...] = h                                           # (D, bt)


def fold_params(params):
    """6 PyTorch-layout (W, b) pairs -> 5 folded layers [(W, b, leaky)] in f32.

    Layers 5 and 6 (Linear -> Linear, no nonlinearity between them in eval
    mode) compose exactly: W65 = W6 @ W5, b65 = W6 @ b5 + b6 (composed in f32
    before any bf16 cast to avoid compounding rounding).
    """
    ps = [(jnp.asarray(w, jnp.float32), jnp.asarray(b, jnp.float32))
          for (w, b) in params]
    (w1, b1), (w2, b2), (w3, b3), (w4, b4), (w5, b5), (w6, b6) = ps
    w65 = w6 @ w5
    b65 = w6 @ b5 + b6
    return [(w1, b1, True), (w2, b2, True), (w3, b3, True), (w4, b4, True),
            (w65, b65, False)]


def _pack_params(folded, embed_dim):
    """Stack all weights / biases into two buffers (zero-padded per layer)."""
    n_layers = len(folded)
    maxd = 2 * embed_dim
    w_stack = jnp.zeros((n_layers, maxd, maxd), jnp.float32)
    b_stack = jnp.zeros((n_layers, maxd, 1), jnp.float32)
    for l, (w, b, _) in enumerate(folded):
        w_stack = w_stack.at[l, : w.shape[0], : w.shape[1]].set(w)
        b_stack = b_stack.at[l, : b.shape[0], 0].set(b)
    return w_stack.astype(jnp.bfloat16), b_stack


def attribute_filter_forward(x, params, *, batch_tile=4096, min_grid_steps=1):
    """x: (B, D) float32. params: 6 (W (out,in), b (out,)) pairs (PyTorch layout).

    min_grid_steps: set to 2 on v7x so the "parallel" grid axis shards across
    both TensorCores even when B fits a single tile (v5e/v6e have 1 TC).
    """
    B, D = x.shape
    assert len(params) == 6
    assert D % 2 == 0, "embed_dim must be even (module has an embed_dim/2 layer)"
    # NOTE: D not a multiple of 8 (or D/2 < 8) still lowers correctly but with
    # heavy sublane/lane padding; D >= 16 recommended.

    folded = fold_params(params)
    layer_dims = tuple((int(w.shape[0]), int(w.shape[1]), leaky)
                       for (w, _, leaky) in folded)
    w_stack, b_stack = _pack_params(folded, D)

    # Batch maps to lanes inside the kernel: tiles are 128-lane multiples,
    # large by default (HBM/overhead-bound at small D), never larger than the
    # lane-padded batch.
    bt = max(_LANE, _round_up(min(int(batch_tile), _round_up(B, _LANE)), _LANE))
    if min_grid_steps > 1 and B > _LANE:
        bt = min(bt, max(_LANE, _round_up(pl.cdiv(B, min_grid_steps), _LANE)))
    num_tiles = pl.cdiv(B, bt)
    B_pad = num_tiles * bt

    x = jnp.asarray(x, jnp.float32)
    if B_pad != B:
        x = jnp.pad(x, ((0, B_pad - B), (0, 0)))   # cheap row pad, no transpose

    x_spec = pl.BlockSpec((bt, D), lambda i: (i, 0))
    w_spec = pl.BlockSpec(w_stack.shape, lambda i: (0, 0, 0))
    b_spec = pl.BlockSpec(b_stack.shape, lambda i: (0, 0, 0))
    out_spec = pl.BlockSpec((D, bt), lambda i: (0, i))
    # NOTE: param block indices are constant across the grid; pl.Buffered(1)
    # would drop their (tiny, ~40 KiB) second buffer -- intentionally skipped
    # for compile safety, negligible at this size.

    # VMEM budget: double-buffered x/out tiles + params + live f32
    # intermediates (largest is (2D, bt)); capped at 32 MiB for v7x's 64 MiB.
    tile_bytes = bt * D * 4
    param_bytes = int(w_stack.size) * 2 + int(b_stack.size) * 4
    footprint = 2 * 2 * tile_bytes + 2 * param_bytes + 6 * (2 * D) * bt * 4
    vmem_limit = int(min(32 * 1024 * 1024, max(16 * 1024 * 1024, 2 * footprint)))

    flops = sum(2 * B_pad * out * fin for (out, fin, _) in layer_dims)
    bytes_accessed = 2 * B_pad * D * 4 + param_bytes

    kernel = functools.partial(attribute_filter_kernel, layer_dims=layer_dims)
    outT = pl.pallas_call(
        kernel,
        out_shape=jax.ShapeDtypeStruct((D, B_pad), jnp.float32),
        grid_spec=pltpu.PrefetchScalarGridSpec(
            num_scalar_prefetch=0,
            grid=(num_tiles,),
            in_specs=[x_spec, w_spec, b_spec],
            out_specs=out_spec,
        ),
        compiler_params=pltpu.CompilerParams(
            dimension_semantics=("parallel",),
            vmem_limit_bytes=vmem_limit,
        ),
        cost_estimate=pl.CostEstimate(
            flops=flops, transcendentals=0, bytes_accessed=bytes_accessed),
    )(x, w_stack, b_stack)
    # TODO(synk): to go fully transpose-free, accept/return the (D, B) layout
    # at the API boundary (the trailing .T costs one extra XLA pass over out).
    return outT[:, :B].T


def init_params(key, embed_dim):
    """nn.Linear-style init (uniform +-1/sqrt(fan_in)); PyTorch (out, in) layout."""
    dims = [
        (2 * embed_dim, embed_dim),
        (embed_dim, 2 * embed_dim),
        (embed_dim // 2, embed_dim),
        (embed_dim, embed_dim // 2),
        (embed_dim, embed_dim),
        (embed_dim, embed_dim),
    ]
    params = []
    for (fan_out, fan_in) in dims:
        key, kw, kb = jax.random.split(key, 3)
        bound = 1.0 / float(fan_in) ** 0.5
        w = jax.random.uniform(kw, (fan_out, fan_in), jnp.float32, -bound, bound)
        b = jax.random.uniform(kb, (fan_out,), jnp.float32, -bound, bound)
        params.append((w, b))
    return params


def reference_forward(x, params):
    """Strict f32 reference of the original 6-layer module (eval mode)."""
    h = jnp.asarray(x, jnp.float32)
    for idx, (w, b) in enumerate(params):
        h = h @ jnp.asarray(w, jnp.float32).T + jnp.asarray(b, jnp.float32)[None, :]
        if idx < 4:  # first four Linear layers are followed by LeakyReLU(0.2)
            h = jnp.where(h > 0, h, _NEG_SLOPE * h)
    return h


def matched_reference_forward(x, params):
    """Pure-JAX reference with the kernel's exact numerics
    (folded last two layers, bf16 MXU operands, f32 accumulation)."""
    h = jnp.asarray(x, jnp.float32)
    for w, b, leaky in fold_params(params):
        h = jnp.dot(h.astype(jnp.bfloat16), w.astype(jnp.bfloat16).T,
                    preferred_element_type=jnp.float32) + b[None, :]
        if leaky:
            h = jnp.where(h > 0, h, _NEG_SLOPE * h)
    return h


if __name__ == "__main__":
    embed_dim = 32
    batch = 300          # not a multiple of 128: exercises the padded tail

    key = jax.random.PRNGKey(0)
    kx, kp = jax.random.split(key)
    x = jax.random.normal(kx, (batch, embed_dim), jnp.float32)
    params = init_params(kp, embed_dim)

    # Default batch_tile=4096 -> a single 384-lane tile for B=300 (per review,
    # multi-tile only pays off for large B, or min_grid_steps=2 on v7x).
    out = attribute_filter_forward(x, params)
    out = jax.block_until_ready(out)
    assert out.shape == (batch, embed_dim)
    assert bool(jnp.all(jnp.isfinite(out)))

    # (a) Folding L5/L6 is algebraically exact (checked in pure f32).
    f32_folded = jnp.asarray(x, jnp.float32)
    for w, b, leaky in fold_params(params):
        f32_folded = f32_folded @ w.T + b[None, :]
        if leaky:
            f32_folded = jnp.where(f32_folded > 0, f32_folded, _NEG_SLOPE * f32_folded)
    f32_ref = reference_forward(x, params)
    assert bool(jnp.allclose(f32_folded, f32_ref, atol=1e-4, rtol=1e-4))

    # (b) Kernel matches the numerics-matched reference tightly.
    ref = matched_reference_forward(x, params)
    max_err = float(jnp.max(jnp.abs(out - ref)))
    assert bool(jnp.allclose(out, ref, atol=2e-3, rtol=2e-3)), max_err

    print("KERNEL_OK")
</pallas_src>

<mosaic_0001>
module attributes {stable_mosaic.version = 11 : i64} {
  func.func @attribute_filter_kernel(%arg0: i32, %arg1: memref<384x32xf32, #tpu.memory_space<vmem>>, %arg2: memref<5x64x64xbf16, #tpu.memory_space<vmem>>, %arg3: memref<5x64x1xf32, #tpu.memory_space<vmem>>, %arg4: memref<32x384xf32, #tpu.memory_space<vmem>>) attributes {dimension_semantics = [#tpu.dimension_semantics<parallel>], iteration_bounds = array<i64: 1>, scalar_prefetch = 0 : i64, scratch_operands = 0 : i64, tpu.core_type = #tpu.core_type<tc>, window_params = [{transform_indices = @transform_0, window_bounds = array<i64: 384, 32>}, {pipeline_mode = #tpu.pipeline_mode<synchronous>, transform_indices = @transform_1, window_bounds = array<i64: 5, 64, 64>}, {pipeline_mode = #tpu.pipeline_mode<synchronous>, transform_indices = @transform_2, window_bounds = array<i64: 5, 64, 1>}, {transform_indices = @transform_3, window_bounds = array<i64: 32, 384>}]} {
    %c0 = arith.constant 0 : index
    %c0_0 = arith.constant 0 : index
    %0 = vector.load %arg1[%c0, %c0_0] : memref<384x32xf32, #tpu.memory_space<vmem>>, vector<384x32xf32>
    %1 = arith.truncf %0 : vector<384x32xf32> to vector<384x32xbf16>
    %c0_1 = arith.constant 0 : index
    %c0_2 = arith.constant 0 : index
    %c0_3 = arith.constant 0 : index
    %2 = vector.load %arg2[%c0_1, %c0_2, %c0_3] : memref<5x64x64xbf16, #tpu.memory_space<vmem>>, vector<1x64x64xbf16>
    %3 = vector.shape_cast %2 : vector<1x64x64xbf16> to vector<64x64xbf16>
    %4 = vector.extract_strided_slice %3 {offsets = [0, 0], sizes = [64, 32], strides = [1, 1]} : vector<64x64xbf16> to vector<64x32xbf16>
    %cst = arith.constant dense<0.000000e+00> : vector<64x384xf32>
    %5 = tpu.matmul %4, %1, %cst {dimension_numbers = #tpu.dot_dimension_numbers<[1], [1], [0], [0], [0, 0, 1, 0], [], []>} : vector<64x32xbf16>, vector<384x32xbf16>, vector<64x384xf32> -> vector<64x384xf32>
    %c0_4 = arith.constant 0 : index
    %c0_5 = arith.constant 0 : index
    %c0_6 = arith.constant 0 : index
    %6 = vector.load %arg3[%c0_4, %c0_5, %c0_6] : memref<5x64x1xf32, #tpu.memory_space<vmem>>, vector<1x64x1xf32>
    %7 = vector.shape_cast %6 : vector<1x64x1xf32> to vector<64x1xf32>
    %8 = vector.broadcast %7 : vector<64x1xf32> to vector<64x384xf32>
    %9 = arith.addf %5, %8 : vector<64x384xf32>
    %cst_7 = arith.constant 0.000000e+00 : f32
    %10 = vector.broadcast %cst_7 : f32 to vector<64x384xf32>
    %11 = arith.cmpf ogt, %9, %10 : vector<64x384xf32>
    %cst_8 = arith.constant 2.000000e-01 : f32
    %12 = vector.broadcast %cst_8 : f32 to vector<64x384xf32>
    %13 = arith.mulf %12, %9 : vector<64x384xf32>
    %14 = arith.select %11, %9, %13 : vector<64x384xi1>, vector<64x384xf32>
    %c1 = arith.constant 1 : index
    %c0_9 = arith.constant 0 : index
    %c0_10 = arith.constant 0 : index
    %15 = vector.load %arg2[%c1, %c0_9, %c0_10] : memref<5x64x64xbf16, #tpu.memory_space<vmem>>, vector<1x64x64xbf16>
    %16 = vector.shape_cast %15 : vector<1x64x64xbf16> to vector<64x64xbf16>
    %17 = vector.extract_strided_slice %16 {offsets = [0, 0], sizes = [32, 64], strides = [1, 1]} : vector<64x64xbf16> to vector<32x64xbf16>
    %18 = arith.truncf %14 : vector<64x384xf32> to vector<64x384xbf16>
    %cst_11 = arith.constant dense<0.000000e+00> : vector<32x384xf32>
    %19 = tpu.matmul %17, %18, %cst_11 {dimension_numbers = #tpu.dot_dimension_numbers<[1], [0], [0], [1], [0, 0, 1, 1], [], []>} : vector<32x64xbf16>, vector<64x384xbf16>, vector<32x384xf32> -> vector<32x384xf32>
    %c1_12 = arith.constant 1 : index
    %c0_13 = arith.constant 0 : index
    %c0_14 = arith.constant 0 : index
    %20 = vector.load %arg3[%c1_12, %c0_13, %c0_14] : memref<5x64x1xf32, #tpu.memory_space<vmem>>, vector<1x64x1xf32>
    %21 = vector.shape_cast %20 : vector<1x64x1xf32> to vector<64x1xf32>
    %22 = vector.extract_strided_slice %21 {offsets = [0, 0], sizes = [32, 1], strides = [1, 1]} : vector<64x1xf32> to vector<32x1xf32>
    %23 = vector.broadcast %22 : vector<32x1xf32> to vector<32x384xf32>
    %24 = arith.addf %19, %23 : vector<32x384xf32>
    %cst_15 = arith.constant 0.000000e+00 : f32
    %25 = vector.broadcast %cst_15 : f32 to vector<32x384xf32>
    %26 = arith.cmpf ogt, %24, %25 : vector<32x384xf32>
    %cst_16 = arith.constant 2.000000e-01 : f32
    %27 = vector.broadcast %cst_16 : f32 to vector<32x384xf32>
    %28 = arith.mulf %27, %24 : vector<32x384xf32>
    %29 = arith.select %26, %24, %28 : vector<32x384xi1>, vector<32x384xf32>
    %c2 = arith.constant 2 : index
    %c0_17 = arith.constant 0 : index
    %c0_18 = arith.constant 0 : index
    %30 = vector.load %arg2[%c2, %c0_17, %c0_18] : memref<5x64x64xbf16, #tpu.memory_space<vmem>>, vector<1x64x64xbf16>
    %31 = vector.shape_cast %30 : vector<1x64x64xbf16> to vector<64x64xbf16>
    %32 = vector.extract_strided_slice %31 {offsets = [0, 0], sizes = [16, 32], strides = [1, 1]} : vector<64x64xbf16> to vector<16x32xbf16>
    %33 = arith.truncf %29 : vector<32x384xf32> to vector<32x384xbf16>
    %cst_19 = arith.constant dense<0.000000e+00> : vector<16x384xf32>
    %34 = tpu.matmul %32, %33, %cst_19 {dimension_numbers = #tpu.dot_dimension_numbers<[1], [0], [0], [1], [0, 0, 1, 1], [], []>} : vector<16x32xbf16>, vector<32x384xbf16>, vector<16x384xf32> -> vector<16x384xf32>
    %c2_20 = arith.constant 2 : index
    %c0_21 = arith.constant 0 : index
    %c0_22 = arith.constant 0 : index
    %35 = vector.load %arg3[%c2_20, %c0_21, %c0_22] : memref<5x64x1xf32, #tpu.memory_space<vmem>>, vector<1x64x1xf32>
    %36 = vector.shape_cast %35 : vector<1x64x1xf32> to vector<64x1xf32>
    %37 = vector.extract_strided_slice %36 {offsets = [0, 0], sizes = [16, 1], strides = [1, 1]} : vector<64x1xf32> to vector<16x1xf32>
    %38 = vector.broadcast %37 : vector<16x1xf32> to vector<16x384xf32>
    %39 = arith.addf %34, %38 : vector<16x384xf32>
    %cst_23 = arith.constant 0.000000e+00 : f32
    %40 = vector.broadcast %cst_23 : f32 to vector<16x384xf32>
    %41 = arith.cmpf ogt, %39, %40 : vector<16x384xf32>
    %cst_24 = arith.constant 2.000000e-01 : f32
    %42 = vector.broadcast %cst_24 : f32 to vector<16x384xf32>
    %43 = arith.mulf %42, %39 : vector<16x384xf32>
    %44 = arith.select %41, %39, %43 : vector<16x384xi1>, vector<16x384xf32>
    %c3 = arith.constant 3 : index
    %c0_25 = arith.constant 0 : index
    %c0_26 = arith.constant 0 : index
    %45 = vector.load %arg2[%c3, %c0_25, %c0_26] : memref<5x64x64xbf16, #tpu.memory_space<vmem>>, vector<1x64x64xbf16>
    %46 = vector.shape_cast %45 : vector<1x64x64xbf16> to vector<64x64xbf16>
    %47 = vector.extract_strided_slice %46 {offsets = [0, 0], sizes = [32, 16], strides = [1, 1]} : vector<64x64xbf16> to vector<32x16xbf16>
    %48 = arith.truncf %44 : vector<16x384xf32> to vector<16x384xbf16>
    %cst_27 = arith.constant dense<0.000000e+00> : vector<32x384xf32>
    %49 = tpu.matmul %47, %48, %cst_27 {dimension_numbers = #tpu.dot_dimension_numbers<[1], [0], [0], [1], [0, 0, 1, 1], [], []>} : vector<32x16xbf16>, vector<16x384xbf16>, vector<32x384xf32> -> vector<32x384xf32>
    %c3_28 = arith.constant 3 : index
    %c0_29 = arith.constant 0 : index
    %c0_30 = arith.constant 0 : index
    %50 = vector.load %arg3[%c3_28, %c0_29, %c0_30] : memref<5x64x1xf32, #tpu.memory_space<vmem>>, vector<1x64x1xf32>
    %51 = vector.shape_cast %50 : vector<1x64x1xf32> to vector<64x1xf32>
    %52 = vector.extract_strided_slice %51 {offsets = [0, 0], sizes = [32, 1], strides = [1, 1]} : vector<64x1xf32> to vector<32x1xf32>
    %53 = vector.broadcast %52 : vector<32x1xf32> to vector<32x384xf32>
    %54 = arith.addf %49, %53 : vector<32x384xf32>
    %cst_31 = arith.constant 0.000000e+00 : f32
    %55 = vector.broadcast %cst_31 : f32 to vector<32x384xf32>
    %56 = arith.cmpf ogt, %54, %55 : vector<32x384xf32>
    %cst_32 = arith.constant 2.000000e-01 : f32
    %57 = vector.broadcast %cst_32 : f32 to vector<32x384xf32>
    %58 = arith.mulf %57, %54 : vector<32x384xf32>
    %59 = arith.select %56, %54, %58 : vector<32x384xi1>, vector<32x384xf32>
    %c4 = arith.constant 4 : index
    %c0_33 = arith.constant 0 : index
    %c0_34 = arith.constant 0 : index
    %60 = vector.load %arg2[%c4, %c0_33, %c0_34] : memref<5x64x64xbf16, #tpu.memory_space<vmem>>, vector<1x64x64xbf16>
    %61 = vector.shape_cast %60 : vector<1x64x64xbf16> to vector<64x64xbf16>
    %62 = vector.extract_strided_slice %61 {offsets = [0, 0], sizes = [32, 32], strides = [1, 1]} : vector<64x64xbf16> to vector<32x32xbf16>
    %63 = arith.truncf %59 : vector<32x384xf32> to vector<32x384xbf16>
    %cst_35 = arith.constant dense<0.000000e+00> : vector<32x384xf32>
    %64 = tpu.matmul %62, %63, %cst_35 {dimension_numbers = #tpu.dot_dimension_numbers<[1], [0], [0], [1], [0, 0, 1, 1], [], []>} : vector<32x32xbf16>, vector<32x384xbf16>, vector<32x384xf32> -> vector<32x384xf32>
    %c4_36 = arith.constant 4 : index
    %c0_37 = arith.constant 0 : index
    %c0_38 = arith.constant 0 : index
    %65 = vector.load %arg3[%c4_36, %c0_37, %c0_38] : memref<5x64x1xf32, #tpu.memory_space<vmem>>, vector<1x64x1xf32>
    %66 = vector.shape_cast %65 : vector<1x64x1xf32> to vector<64x1xf32>
    %67 = vector.extract_strided_slice %66 {offsets = [0, 0], sizes = [32, 1], strides = [1, 1]} : vector<64x1xf32> to vector<32x1xf32>
    %68 = vector.broadcast %67 : vector<32x1xf32> to vector<32x384xf32>
    %69 = arith.addf %64, %68 : vector<32x384xf32>
    %c0_39 = arith.constant 0 : index
    %c0_40 = arith.constant 0 : index
    %70 = vector.load %arg4[%c0_39, %c0_40] : memref<32x384xf32, #tpu.memory_space<vmem>>, vector<32x384xf32>
    tpu.vector_store %arg4[%c0_39, %c0_40], %69 {strides = array<i32>} : memref<32x384xf32, #tpu.memory_space<vmem>>, vector<32x384xf32>,
    return
  }
  func.func @transform_0(%arg0: i32) -> (i32, i32) {
    %c0_i32 = arith.constant 0 : i32
    %c0_i32_0 = arith.constant 0 : i32
    return %arg0, %c0_i32 : i32, i32
  }
  func.func @transform_1(%arg0: i32) -> (i32, i32, i32) {
    %c0_i32 = arith.constant 0 : i32
    %c0_i32_0 = arith.constant 0 : i32
    %c0_i32_1 = arith.constant 0 : i32
    %c0_i32_2 = arith.constant 0 : i32
    return %c0_i32, %c0_i32_0, %c0_i32_1 : i32, i32, i32
  }
  func.func @transform_2(%arg0: i32) -> (i32, i32, i32) {
    %c0_i32 = arith.constant 0 : i32
    %c0_i32_0 = arith.constant 0 : i32
    %c0_i32_1 = arith.constant 0 : i32
    %c0_i32_2 = arith.constant 0 : i32
    return %c0_i32, %c0_i32_0, %c0_i32_1 : i32, i32, i32
  }
  func.func @transform_3(%arg0: i32) -> (i32, i32) {
    %c0_i32 = arith.constant 0 : i32
    %c0_i32_0 = arith.constant 0 : i32
    return %c0_i32, %arg0 : i32, i32
  }
}

</mosaic_0001>

<bundles_post_ra>
// kernel: tpu_custom_call.1
= control target key start
LH: loop header
LB: loop body
LE: loop exit
PB: predicated region body
PF: predicated region fallthrough
CT: control target
= control target key end

     0   :  { %vm164_vm0 = vcmask 261120   ;;  %v1388_v7 = vmov 0   ;;  %s1780_s0 = inlined_call_operand.vmem [shape: f32[384,32], index: 0, kind: input, shape index: {}]   ;;  %s1781_s1 = inlined_call_operand.vmem [shape: bf16[5,64,64], index: 1, kind: input, shape index: {}]   ;;  %s1782_s2 = inlined_call_operand.vmem [shape: f32[5,64,1], index: 2, kind: input, shape index: {}]   ;;  %s1783_s3 = inlined_call_operand.hbm [shape: f32[32,384], index: 3, kind: output, shape index: {}]  }
   0x1   :  { %v32_v0 = vld [vmem:[%s1780_s0 + $0x80] sm:$0xff]  ;;  %v33_v1 = vld [vmem:[%s1780_s0 + $0x88] sm:$0xff]  ;;  %1351 = vset.pattern.permute.xlu0 %v1388_v7  ;;  %1352 = vset.pattern.permute.xlu1 %v1388_v7  ;;  %v34_v10 = vld [vmem:[%s1780_s0 + $0x90] sm:$0xff] }
   0x2   :  { %v48_v2 = vld [vmem:[%s1780_s0 + $0x100] sm:$0xff]  ;;  %v72_v3 = vpack.c.bf16 %v33_v1, %v32_v0  ;;  %v49_v4 = vld [vmem:[%s1780_s0 + $0x108] sm:$0xff]  ;;  %v35_v11 = vld [vmem:[%s1780_s0 + $0x98] sm:$0xff] }
   0x3   :  { %v16_v5 = vld [vmem:[%s1780_s0] sm:$0xff]  ;;  %v17_v6 = vld [vmem:[%s1780_s0 + $0x8] sm:$0xff]  ;;  %v80_v8 = vpack.c.bf16 %v49_v4, %v48_v2  ;;  %v50_v12 = vld [vmem:[%s1780_s0 + $0x110] sm:$0xff]  ;;  %v73_v13 = vpack.c.bf16 %v35_v11, %v34_v10 }
   0x4   :  { %v64_v9 = vpack.c.bf16 %v17_v6, %v16_v5  ;;  %1329 = vmatprep.subr.msk.bf16.mxu0 %vm164_vm0, %v72_v3  ;;  %v51_v14 = vld [vmem:[%s1780_s0 + $0x118] sm:$0xff]  ;;  %v18_v15 = vld [vmem:[%s1780_s0 + $0x10] sm:$0xff]  ;;  %v36_v21 = vld [vmem:[%s1780_s0 + $0xa0] sm:$0xff] }
   0x5   :  { %v19_v16 = vld [vmem:[%s1780_s0 + $0x18] sm:$0xff]  ;;  %1337 = vmatprep.subr.msk.bf16.mxu1 %vm164_vm0, %v80_v8  ;;  %v226_v18 = vsel %vm164_vm0, %v80_v8, 0  ;;  %v81_v19 = vpack.c.bf16 %v51_v14, %v50_v12  ;;  %v37_v22 = vld [vmem:[%s1780_s0 + $0xa8] sm:$0xff]  ;;  %v52_v23 = vld [vmem:[%s1780_s0 + $0x120] sm:$0xff] }
   0x6   :  { %v178_v17 = vsel %vm164_vm0, %v64_v9, 0  ;;  %1272 = vmatpush3.bf16.xpose.msra.mxu1 %v226_v18  ;;  %v65_v20 = vpack.c.bf16 %v19_v16, %v18_v15  ;;  %v53_v24 = vld [vmem:[%s1780_s0 + $0x128] sm:$0xff]  ;;  %v74_v27 = vpack.c.bf16 %v37_v22, %v36_v21  ;;  %v20_v29 = vld [vmem:[%s1780_s0 + $0x20] sm:$0xff]  ;;  %v38_v32 = vld [vmem:[%s1780_s0 + $0xb0] sm:$0xff] }
   0x7   :  { %1220 = vmatpush3.bf16.xpose.msra.mxu0 %v178_v17  ;;  %1338 = vmatprep.subr.msk.bf16.mxu1 %vm164_vm0, %v81_v19  ;;  %v229_v26 = vsel %vm164_vm0, %v81_v19, 0  ;;  %v82_v28 = vpack.c.bf16 %v53_v24, %v52_v23  ;;  %v21_v30 = vld [vmem:[%s1780_s0 + $0x28] sm:$0xff]  ;;  %v39_v33 = vld [vmem:[%s1780_s0 + $0xb8] sm:$0xff]  ;;  %v54_v34 = vld [vmem:[%s1780_s0 + $0x130] sm:$0xff] }
   0x8   :  { %1330 = vmatprep.subr.msk.bf16.mxu0 %vm164_vm0, %v73_v13  ;;  %v181_v25 = vsel %vm164_vm0, %v65_v20, 0  ;;  %v66_v31 = vpack.c.bf16 %v21_v30, %v20_v29  ;;  %v55_v35 = vld [vmem:[%s1780_s0 + $0x138] sm:$0xff]  ;;  %v1495_v36 = vld [vmem:[%s1781_s1] sm:$0xff]   ;;  %v75_v39 = vpack.c.bf16 %v39_v33, %v38_v32  ;;  %v22_v41 = vld [vmem:[%s1780_s0 + $0x30] sm:$0xff] }
   0x9   :  { %v232_v38 = vsel %vm164_vm0, %v82_v28, 0  ;;  %v83_v40 = vpack.c.bf16 %v55_v35, %v54_v34  ;;  %v23_v42 = vld [vmem:[%s1780_s0 + $0x38] sm:$0xff]  ;;  %1235 = vmatprep.mubr.msk.bf16.mxu0 %vm164_vm0, %v1495_v36  ;;  %1287 = vmatprep.mubr.msk.bf16.mxu1 %vm164_vm0, %v1495_v36  ;;  %v96_v43 = vld [vmem:[%s1782_s2] sm:$0xff]  ;;  %v98_v44 = vld [vmem:[%s1782_s2 + $0x10] sm:$0xff] }
   0xa   :  { %v184_v37 = vsel %vm164_vm0, %v66_v31, 0  ;;  %v67_v45 = vpack.c.bf16 %v23_v42, %v22_v41  ;;  %v40_v46 = vld [vmem:[%s1780_s0 + $0xc0] sm:$0xff]  ;;  %v41_v47 = vld [vmem:[%s1780_s0 + $0xc8] sm:$0xff]  ;;  %106 = vperm.xlu0 %1351, %v96_v43   ;;  %116 = vperm.xlu1 %1352, %v98_v44   ;;  %v99_v51 = vld [vmem:[%s1782_s2 + $0x18] sm:$0xff] }
   0xb   :  { %v56_v48 = vld [vmem:[%s1780_s0 + $0x140] sm:$0xff]  ;;  %v57_v49 = vld [vmem:[%s1780_s0 + $0x148] sm:$0xff]  ;;  %v235_v53 = vsel %vm164_vm0, %v83_v40, 0  ;;  %v76_v54 = vpack.c.bf16 %v41_v47, %v40_v46  ;;  %v42_v60 = vld [vmem:[%s1780_s0 + $0xd0] sm:$0xff] }
   0xc   :  { %v97_v50 = vld [vmem:[%s1782_s2 + $0x8] sm:$0xff]  ;;  %v187_v52 = vsel %vm164_vm0, %v67_v45, 0  ;;  %v84_v55 = vpack.c.bf16 %v57_v49, %v56_v48  ;;  %v24_v56 = vld [vmem:[%s1780_s0 + $0x40] sm:$0xff]  ;;  %v43_v61 = vld [vmem:[%s1780_s0 + $0xd8] sm:$0xff] }
   0xd   :  { %v25_v57 = vld [vmem:[%s1780_s0 + $0x48] sm:$0xff]  ;;  %v100_v58 = vld [vmem:[%s1782_s2 + $0x20] sm:$0xff]  ;;  %v58_v62 = vld [vmem:[%s1780_s0 + $0x150] sm:$0xff] }
   0xe   :  { %1274 = vmatpush3.bf16.xpose.msra.mxu1 %v229_v26  ;;  %111 = vperm.xlu0 %1351, %v97_v50   ;;  %v101_v59 = vld [vmem:[%s1782_s2 + $0x28] sm:$0xff]  ;;  %v59_v63 = vld [vmem:[%s1780_s0 + $0x158] sm:$0xff]  ;;  %v68_v0 = vpack.c.bf16 %v25_v57, %v24_v56  ;;  %v102_v1 = vld [vmem:[%s1782_s2 + $0x30] sm:$0xff] }
   0xf   :  { %1222 = vmatpush3.bf16.xpose.msra.mxu0 %v181_v25  ;;  %1339 = vmatprep.subr.msk.bf16.mxu1 %vm164_vm0, %v82_v28  ;;  %v103_v2 = vld [vmem:[%s1782_s2 + $0x38] sm:$0xff] }
  0x10   :  { %1331 = vmatprep.subr.msk.bf16.mxu0 %vm164_vm0, %v74_v27  ;;  %121 = vperm.xlu1 %1352, %v99_v51  }
  0x12   :  { %126 = vperm.xlu0 %1351, %v100_v58  }
  0x14   :  { %131 = vperm.xlu1 %1352, %v101_v59  }
  0x16   :  { %1276 = vmatpush3.bf16.xpose.msra.mxu1 %v232_v38 }
  0x17   :  { %1224 = vmatpush3.bf16.xpose.msra.mxu0 %v184_v37  ;;  %1340 = vmatprep.subr.msk.bf16.mxu1 %vm164_vm0, %v83_v40 }
  0x18   :  { %1332 = vmatprep.subr.msk.bf16.mxu0 %vm164_vm0, %v75_v39 }
  0x1e   :  { %1278 = vmatpush3.bf16.xpose.msra.mxu1 %v235_v53 }
  0x1f   :  { %1226 = vmatpush3.bf16.xpose.msra.mxu0 %v187_v52  ;;  %1341 = vmatprep.subr.msk.bf16.mxu1 %vm164_vm0, %v84_v55 }
  0x20   :  { %1333 = vmatprep.subr.msk.bf16.mxu0 %vm164_vm0, %v76_v54 }
  0x21   :  { %8 = vsyncpa [#allocation3], 0  ;;  %v190_v3 = vsel %vm164_vm0, %v68_v0, 0  ;;  %v238_v4 = vsel %vm164_vm0, %v84_v55, 0  ;;  %v77_v5 = vpack.c.bf16 %v43_v61, %v42_v60  ;;  %v85_v6 = vpack.c.bf16 %v59_v63, %v58_v62  ;;  %v26_v8 = vld [vmem:[%s1780_s0 + $0x50] sm:$0xff]  ;;  %v27_v9 = vld [vmem:[%s1780_s0 + $0x58] sm:$0xff]  ;;  %136 = vperm.xlu0 %1351, %v102_v1   ;;  %141 = vperm.xlu1 %1352, %v103_v2  }
  0x22   :  { %v1174_v10 = vld [vmem:[%s1782_s2 + $0x40] sm:$0xff]  ;;  %v1175_v11 = vld [vmem:[%s1782_s2 + $0x48] sm:$0xff]  ;;  %v69_v12 = vpack.c.bf16 %v27_v9, %v26_v8  ;;  %v1176_v17 = vld [vmem:[%s1782_s2 + $0x50] sm:$0xff]  ;;  %vm511_vm1 = vcmask 523264  }
  0x23   :  { %v44_v13 = vld [vmem:[%s1780_s0 + $0xe0] sm:$0xff]  ;;  %v45_v14 = vld [vmem:[%s1780_s0 + $0xe8] sm:$0xff]  ;;  %v1177_v18 = vld [vmem:[%s1782_s2 + $0x58] sm:$0xff]  ;;  %v241_v20 = vsel %vm164_vm0, %v85_v6, 0 }
  0x24   :  { %v60_v15 = vld [vmem:[%s1780_s0 + $0x160] sm:$0xff]  ;;  %v61_v16 = vld [vmem:[%s1780_s0 + $0x168] sm:$0xff]  ;;  %v193_v19 = vsel %vm164_vm0, %v69_v12, 0  ;;  %v78_v21 = vpack.c.bf16 %v45_v14, %v44_v13  ;;  %v46_v28 = vld [vmem:[%s1780_s0 + $0xf0] sm:$0xff] }
  0x25   :  { %483 = vperm.xlu0 %1351, %v1174_v10   ;;  %488 = vperm.xlu1 %1352, %v1175_v11   ;;  %v86_v22 = vpack.c.bf16 %v61_v16, %v60_v15  ;;  %v28_v23 = vld [vmem:[%s1780_s0 + $0x60] sm:$0xff]  ;;  %v29_v24 = vld [vmem:[%s1780_s0 + $0x68] sm:$0xff]  ;;  %v47_v29 = vld [vmem:[%s1780_s0 + $0xf8] sm:$0xff] }
  0x26   :  { %1280 = vmatpush3.bf16.xpose.msra.mxu1 %v238_v4  ;;  %v1186_v25 = vld [vmem:[%s1782_s2 + $0x80] sm:$0xff]  ;;  %v1187_v26 = vld [vmem:[%s1782_s2 + $0x88] sm:$0xff]  ;;  %v70_v27 = vpack.c.bf16 %v29_v24, %v28_v23  ;;  %v62_v30 = vld [vmem:[%s1780_s0 + $0x170] sm:$0xff]  ;;  %v79_v37 = vpack.c.bf16 %v47_v29, %v46_v28 }
  0x27   :  { %1228 = vmatpush3.bf16.xpose.msra.mxu0 %v190_v3  ;;  %1342 = vmatprep.subr.msk.bf16.mxu1 %vm164_vm0, %v85_v6  ;;  %v63_v31 = vld [vmem:[%s1780_s0 + $0x178] sm:$0xff]  ;;  %v1195_v32 = vld [vmem:[%s1782_s2 + $0xc0] sm:$0xff]  ;;  %v1196_v33 = vld [vmem:[%s1782_s2 + $0xc8] sm:$0xff]  ;;  %v244_v35 = vsel %vm164_vm0, %v86_v22, 0 }
  0x28   :  { %1334 = vmatprep.subr.msk.bf16.mxu0 %vm164_vm0, %v77_v5  ;;  %v196_v34 = vsel %vm164_vm0, %v70_v27, 0  ;;  %v87_v38 = vpack.c.bf16 %v63_v31, %v62_v30  ;;  %v30_v39 = vld [vmem:[%s1780_s0 + $0x70] sm:$0xff]  ;;  %v31_v40 = vld [vmem:[%s1780_s0 + $0x78] sm:$0xff]  ;;  %v1209_v44 = vld [vmem:[%s1782_s2 + $0x100] sm:$0xff] }
  0x29   :  { %493 = vperm.xlu0 %1351, %v1176_v17   ;;  %498 = vperm.xlu1 %1352, %v1177_v18   ;;  %v1197_v41 = vld [vmem:[%s1782_s2 + $0xd0] sm:$0xff]  ;;  %v1198_v42 = vld [vmem:[%s1782_s2 + $0xd8] sm:$0xff]  ;;  %v71_v43 = vpack.c.bf16 %v31_v40, %v30_v39  ;;  %v1210_v45 = vld [vmem:[%s1782_s2 + $0x108] sm:$0xff] }
  0x2a   :  { %v247_v47 = vsel %vm164_vm0, %v87_v38, 0  ;;  %v1211_v48 = vld [vmem:[%s1782_s2 + $0x110] sm:$0xff]  ;;  %v1212_v49 = vld [vmem:[%s1782_s2 + $0x118] sm:$0xff]  ;;  %v1354_v50 = vld [vmem:[%s1781_s1 + $0x8] sm:$0xff]  }
  0x2b   :  { %v199_v46 = vsel %vm164_vm0, %v71_v43, 0  ;;  %v1355_v51 = vld [vmem:[%s1781_s1 + $0x10] sm:$0xff]   ;;  %v1356_v52 = vld [vmem:[%s1781_s1 + $0x18] sm:$0xff]  }
  0x2d   :  { %670 = vperm.xlu0 %1351, %v1186_v25   ;;  %675 = vperm.xlu1 %1352, %v1187_v26  }
  0x2e   :  { %1282 = vmatpush3.bf16.xpose.msra.mxu1 %v241_v20 }
  0x2f   :  { %1230 = vmatpush3.bf16.xpose.msra.mxu0 %v193_v19  ;;  %1343 = vmatprep.subr.msk.bf16.mxu1 %vm164_vm0, %v86_v22 }
  0x30   :  { %1335 = vmatprep.subr.msk.bf16.mxu0 %vm164_vm0, %v78_v21 }
  0x31   :  { %803 = vperm.xlu0 %1351, %v1195_v32   ;;  %808 = vperm.xlu1 %1352, %v1196_v33  }
  0x35   :  { %813 = vperm.xlu0 %1351, %v1197_v41   ;;  %818 = vperm.xlu1 %1352, %v1198_v42  }
  0x36   :  { %1284 = vmatpush3.bf16.xpose.msra.mxu1 %v244_v35 }
  0x37   :  { %1232 = vmatpush3.bf16.xpose.msra.mxu0 %v196_v34  ;;  %1344 = vmatprep.subr.msk.bf16.mxu1 %vm164_vm0, %v87_v38 }
  0x38   :  { %1336 = vmatprep.subr.msk.bf16.mxu0 %vm164_vm0, %v79_v37 }
  0x39   :  { %994 = vperm.xlu0 %1351, %v1209_v44   ;;  %999 = vperm.xlu1 %1352, %v1210_v45  }
  0x3d   :  { %1004 = vperm.xlu0 %1351, %v1211_v48   ;;  %1009 = vperm.xlu1 %1352, %v1212_v49  }
  0x3e   :  { %1286 = vmatpush3.bf16.xpose.msra.mxu1 %v247_v47 }
  0x3f   :  { %1234 = vmatpush3.bf16.xpose.msra.mxu0 %v199_v46 }
  0x45   :  { %1288 = vmatmul.mubr.msk.bf16.vlgmr.msra.gmra.mrb[0].mxu1 %vm164_vm0, %v1354_v50 }
  0x46   :  { %1236 = vmatmul.mubr.msk.bf16.vlgmr.msra.gmra.mrb[0].mxu0 %vm164_vm0, %v1495_v36  ;;  %1291 = vmatprep.mubr.msk.bf16.mxu1 %vm164_vm0, %v1355_v51  ;;  %v1691_v36 = vld [vmem:[%s1781_s1 + $0x20] sm:$0xff]  }
  0x47   :  { %1237 = vmatprep.mubr.msk.bf16.mxu0 %vm164_vm0, %v1354_v50 }
  0x4d   :  { %1292 = vmatmul.mubr.msk.bf16.gmra.mrb[4].mxu1 %vm164_vm0, %v1356_v52 }
  0x4e   :  { %1238 = vmatmul.mubr.msk.bf16.gmra.mrb[4].mxu0 %vm164_vm0, %v1354_v50  ;;  %550 = vmatprep.mubr.bf16.mxu1 %v1388_v7 }
  0x4f   :  { %1239 = vmatprep.mubr.msk.bf16.mxu0 %vm164_vm0, %v1355_v51 }
  0x56   :  { %1240 = vmatmul.mubr.msk.bf16.gmra.mrb[8].mxu0 %vm164_vm0, %v1355_v51 }
  0x57   :  { %1241 = vmatprep.mubr.msk.bf16.mxu0 %vm164_vm0, %v1356_v52 }
  0x5e   :  { %1242 = vmatmul.mubr.msk.bf16.gmra.mrb[12].mxu0 %vm164_vm0, %v1356_v52 }
  0x5f   :  { %1303 = vmatprep.mubr.msk.bf16.mxu0 %vm511_vm1, %v1691_v36 }
  0x89   :  { %v107_v53 = vpop.permute.xlu0 %106  ;;  %v117_v54 = vpop.permute.xlu1 %116 }
  0x8d   :  { %v112_v55 = vpop.permute.xlu0 %111 }
  0x8f   :  { %v1695_v56 = vpop.permute.xlu1 %121 }
  0x91   :  { %v1697_v57 = vpop.permute.xlu0 %126 }
  0x93   :  { %v1700_v17 = vpop.permute.xlu1 %131 }
  0xa0   :  { %v1702_v20 = vpop.permute.xlu0 %136  ;;  %v1709_v44 = vpop.permute.xlu1 %141 }
 0x118   :  { %v1289_v59 = vpop.f32.mrb[0].mxu1 }
 0x119   :  { %v283_v58 = vpop.f32.mrb[0].mxu0  ;;  %v365_v61 = vadd.f32 %v1289_v59, %v117_v54  ;;  %v356_v63 = vpop.f32.mrb[1].mxu1 }
 0x11a   :  { %v284_v60 = vadd.f32 %v283_v58, %v107_v53  ;;  %v285_v62 = vpop.f32.mrb[1].mxu0  ;;  %v357_v1 = vadd.f32 %v356_v63, %v107_v53  ;;  %v1290_v3 = vpop.f32.mrb[2].mxu1 }
 0x11b   :  { %v286_v0 = vadd.f32 %v285_v62, %v107_v53  ;;  %v287_v2 = vpop.f32.mrb[2].mxu0  ;;  %vm395_vm3 = vcmp.gt.f32.partialorder %v365_v61, 0.0  ;;  %v419_v5 = vmul.f32 0.2, %v365_v61  ;;  %v368_v10 = vadd.f32 %v1290_v3, %v1695_v56  ;;  %v359_v12 = vpop.f32.mrb[3].mxu1 }
 0x11c   :  { %vm387_vm2 = vcmp.gt.f32.partialorder %v284_v60, 0.0  ;;  %v411_v4 = vmul.f32 0.2, %v284_v60  ;;  %vm389_vm5 = vcmp.gt.f32.partialorder %v357_v1, 0.0  ;;  %v413_v8 = vmul.f32 0.2, %v357_v1 }
 0x11d   :  { %vm388_vm4 = vcmp.gt.f32.partialorder %v286_v0, 0.0  ;;  %v412_v6 = vmul.f32 0.2, %v286_v0  ;;  %v288_v9 = vadd.f32 %v287_v2, %v112_v55  ;;  %v289_v11 = vpop.f32.mrb[3].mxu0  ;;  %v360_v15 = vadd.f32 %v359_v12, %v112_v55 }
 0x11e   :  { %v435_v13 = vsel %vm387_vm2, %v284_v60, %v411_v4  ;;  %v290_v14 = vadd.f32 %v289_v11, %v112_v55  ;;  %v443_v16 = vsel %vm395_vm3, %v365_v61, %v419_v5  ;;  %vm398_vm7 = vcmp.gt.f32.partialorder %v368_v10, 0.0 }
 0x11f   :  { %vm390_vm6 = vcmp.gt.f32.partialorder %v288_v9, 0.0  ;;  %v414_v18 = vmul.f32 0.2, %v288_v9  ;;  %v422_v19 = vmul.f32 0.2, %v368_v10  ;;  %vm392_vm9 = vcmp.gt.f32.partialorder %v360_v15, 0.0 }
 0x120   :  { %vm391_vm8 = vcmp.gt.f32.partialorder %v290_v14, 0.0  ;;  %v415_v21 = vmul.f32 0.2, %v290_v14  ;;  %v416_v22 = vmul.f32 0.2, %v360_v15  ;;  %v1293_v25 = vpop.f32.mrb[4].mxu1  ;;  %v436_v26 = vsel %vm388_vm4, %v286_v0, %v412_v6 }
 0x121   :  { %v438_v23 = vsel %vm390_vm6, %v288_v9, %v414_v18  ;;  %v293_v24 = vpop.f32.mrb[4].mxu0  ;;  %v437_v27 = vsel %vm389_vm5, %v357_v1, %v413_v8  ;;  %v446_v28 = vsel %vm398_vm7, %v368_v10, %v422_v19  ;;  %v381_v31 = vadd.f32 %v1293_v25, %v1702_v20  ;;  %v372_v33 = vpop.f32.mrb[5].mxu1 }
 0x122   :  { %v464_v29 = vpack.c.bf16 %v438_v23, %v435_v13  ;;  %v294_v30 = vadd.f32 %v293_v24, %v117_v54  ;;  %v295_v32 = vpop.f32.mrb[5].mxu0  ;;  %v439_v34 = vsel %vm391_vm8, %v290_v14, %v415_v21  ;;  %v373_v37 = vadd.f32 %v372_v33, %v1697_v57  ;;  %v1294_v39 = vpop.f32.mrb[6].mxu1 }
 0x123   :  { %v296_v35 = vadd.f32 %v295_v32, %v117_v54  ;;  %v297_v38 = vpop.f32.mrb[6].mxu0  ;;  %v465_v40 = vpack.c.bf16 %v439_v34, %v436_v26  ;;  %v440_v41 = vsel %vm392_vm9, %v360_v15, %v416_v22  ;;  %vm407_vm11 = vcmp.gt.f32.partialorder %v381_v31, 0.0  ;;  %v375_v51 = vpop.f32.mrb[7].mxu1 }
 0x124   :  { %vm393_vm10 = vcmp.gt.f32.partialorder %v294_v30, 0.0  ;;  %v417_v42 = vmul.f32 0.2, %v294_v30  ;;  %v431_v43 = vmul.f32 0.2, %v381_v31  ;;  %vm401_vm13 = vcmp.gt.f32.partialorder %v373_v37, 0.0 }
 0x125   :  { %vm394_vm12 = vcmp.gt.f32.partialorder %v296_v35, 0.0  ;;  %v418_v45 = vmul.f32 0.2, %v296_v35  ;;  %v425_v46 = vmul.f32 0.2, %v373_v37  ;;  %518 = vmatprep.subr.bf16.mxu1 %v465_v40  ;;  %v298_v48 = vadd.f32 %v297_v38, %v1695_v56  ;;  %v299_v50 = vpop.f32.mrb[7].mxu0 }
 0x126   :  { %v441_v47 = vsel %vm393_vm10, %v294_v30, %v417_v42  ;;  %v384_v49 = vadd.f32 %v1294_v39, %v1709_v44  ;;  %v466_v52 = vpack.c.bf16 %v440_v41, %v437_v27  ;;  %519 = vmatpush1.bf16.msra.mxu1 %v464_v29  ;;  %v300_v53 = vadd.f32 %v299_v50, %v1695_v56  ;;  %v1358_v38 = vld [vmem:[%s1781_s1 + $0x28] sm:$0xff]  }
 0x127   :  { %v376_v54 = vadd.f32 %v375_v51, %v1700_v17  ;;  %v469_v55 = vpack.c.bf16 %v446_v28, %v443_v16  ;;  %v442_v58 = vsel %vm394_vm12, %v296_v35, %v418_v45  ;;  %vm396_vm14 = vcmp.gt.f32.partialorder %v298_v48, 0.0 }
 0x128   :  { %v420_v59 = vmul.f32 0.2, %v298_v48  ;;  %vm410_vm15 = vcmp.gt.f32.partialorder %v384_v49, 0.0  ;;  %v434_v60 = vmul.f32 0.2, %v384_v49  ;;  %1295 = vmatprep.subr.bf16.mxu0 %v466_v52  ;;  %vm397_vm2 = vcmp.gt.f32.partialorder %v300_v53, 0.0 }
 0x129   :  { %v421_v61 = vmul.f32 0.2, %v300_v53  ;;  %vm404_vm3 = vcmp.gt.f32.partialorder %v376_v54, 0.0  ;;  %v428_v62 = vmul.f32 0.2, %v376_v54  ;;  %1296 = vmatpush3.bf16.msra.mxu0 %v466_v52  ;;  %v303_v0 = vpop.f32.mrb[8].mxu0  ;;  %v449_v1 = vsel %vm401_vm13, %v373_v37, %v425_v46 }
 0x12a   :  { %v444_v63 = vsel %vm396_vm14, %v298_v48, %v420_v59  ;;  %1297 = vmatprep.subr.bf16.mxu0 %v469_v55  ;;  %v455_v56 = vsel %vm407_vm11, %v381_v31, %v431_v43  ;;  %v458_v2 = vsel %vm410_vm15, %v384_v49, %v434_v60  ;;  %v304_v4 = vadd.f32 %v303_v0, %v1697_v57  ;;  %v305_v5 = vpop.f32.mrb[9].mxu0  ;;  %v489_v48 = vpop.permute.xlu1 %488 }
 0x12b   :  { %v467_v3 = vpack.c.bf16 %v444_v63, %v441_v47  ;;  %v445_v6 = vsel %vm397_vm2, %v300_v53, %v421_v61  ;;  %v452_v8 = vsel %vm404_vm3, %v376_v54, %v428_v62  ;;  %v306_v9 = vadd.f32 %v305_v5, %v1697_v57  ;;  %v307_v10 = vpop.f32.mrb[10].mxu0  ;;  %v484_v47 = vpop.permute.xlu0 %483 }
 0x12c   :  { %v468_v11 = vpack.c.bf16 %v445_v6, %v442_v58  ;;  %v472_v12 = vpack.c.bf16 %v452_v8, %v449_v1  ;;  %v475_v13 = vpack.c.bf16 %v458_v2, %v455_v56  ;;  %v423_v14 = vmul.f32 0.2, %v304_v4  ;;  %v309_v16 = vpop.f32.mrb[11].mxu0 }
 0x12d   :  { %1298 = vmatpush3.bf16.msra.mxu0 %v469_v55  ;;  %v308_v15 = vadd.f32 %v307_v10, %v1700_v17  ;;  %vm399_vm4 = vcmp.gt.f32.partialorder %v304_v4, 0.0  ;;  %v424_v18 = vmul.f32 0.2, %v306_v9  ;;  %v310_v19 = vadd.f32 %v309_v16, %v1700_v17 }
 0x12e   :  { %520 = vmatprep.subr.bf16.mxu1 %v468_v11  ;;  %1299 = vmatprep.subr.bf16.mxu0 %v472_v12  ;;  %vm400_vm5 = vcmp.gt.f32.partialorder %v306_v9, 0.0  ;;  %v447_v23 = vsel %vm399_vm4, %v304_v4, %v423_v14  ;;  %v1389_v46 = vmov 0.0   ;;  %vm1390_vm12 = vmmov 0   ;;  %v499_v53 = vpop.permute.xlu1 %498 }
 0x12f   :  { %vm402_vm6 = vcmp.gt.f32.partialorder %v308_v15, 0.0  ;;  %v426_v21 = vmul.f32 0.2, %v308_v15  ;;  %521 = vmatpush1.bf16.msra.mxu1 %v467_v3  ;;  %vm403_vm7 = vcmp.gt.f32.partialorder %v310_v19, 0.0  ;;  %v427_v57 = vmul.f32 0.2, %v310_v19  ;;  %v494_v49 = vpop.permute.xlu0 %493 }
 0x130   :  { %v448_v29 = vsel %vm400_vm5, %v306_v9, %v424_v18 }
 0x131   :  { %v313_v22 = vpop.f32.mrb[12].mxu0  ;;  %v450_v24 = vsel %vm402_vm6, %v308_v15, %v426_v21  ;;  %1300 = vmatpush3.bf16.msra.mxu0 %v472_v12  ;;  %v451_v30 = vsel %vm403_vm7, %v310_v19, %v427_v57  ;;  %v1359_v57 = vld [vmem:[%s1781_s1 + $0x40] sm:$0xff]  }
 0x132   :  { %v314_v25 = vadd.f32 %v313_v22, %v1702_v20  ;;  %v315_v26 = vpop.f32.mrb[13].mxu0  ;;  %v470_v27 = vpack.c.bf16 %v450_v24, %v447_v23  ;;  %1301 = vmatprep.subr.bf16.mxu0 %v475_v13  ;;  %v471_v34 = vpack.c.bf16 %v451_v30, %v448_v29 }
 0x133   :  { %v316_v28 = vadd.f32 %v315_v26, %v1702_v20  ;;  %v317_v17 = vpop.f32.mrb[14].mxu0 }
 0x134   :  { %v429_v31 = vmul.f32 0.2, %v314_v25  ;;  %v318_v32 = vadd.f32 %v317_v17, %v1709_v44  ;;  %v319_v33 = vpop.f32.mrb[15].mxu0  ;;  %vm405_vm8 = vcmp.gt.f32.partialorder %v314_v25, 0.0  ;;  %522 = vmatprep.subr.bf16.mxu1 %v471_v34 }
 0x135   :  { %v430_v35 = vmul.f32 0.2, %v316_v28  ;;  %v320_v37 = vadd.f32 %v319_v33, %v1709_v44  ;;  %1302 = vmatpush3.bf16.msra.mxu0 %v475_v13  ;;  %vm406_vm9 = vcmp.gt.f32.partialorder %v316_v28, 0.0  ;;  %523 = vmatpush1.bf16.msra.mxu1 %v470_v27 }
 0x136   :  { %vm408_vm10 = vcmp.gt.f32.partialorder %v318_v32, 0.0  ;;  %v432_v20 = vmul.f32 0.2, %v318_v32  ;;  %v453_v40 = vsel %vm405_vm8, %v314_v25, %v429_v31  ;;  %1307 = vmatprep.subr.bf16.mxu0 %v1389_v46 }
 0x137   :  { %vm409_vm11 = vcmp.gt.f32.partialorder %v320_v37, 0.0  ;;  %v433_v39 = vmul.f32 0.2, %v320_v37  ;;  %v454_v43 = vsel %vm406_vm9, %v316_v28, %v430_v35 }
 0x138   :  { %v456_v41 = vsel %vm408_vm10, %v318_v32, %v432_v20  ;;  %1304 = vmatmul.mubr.msk.bf16.vlgmr.msra.gmra.mrb[16].mxu0 %vm511_vm1, %v1358_v38  ;;  %vm831_vm10 = vcmask 130048  }
 0x139   :  { %v473_v42 = vpack.c.bf16 %v456_v41, %v453_v40  ;;  %v457_v45 = vsel %vm409_vm11, %v320_v37, %v433_v39  ;;  %1311 = vmatprep.mubr.msk.bf16.mxu0 %vm1390_vm12, %v1389_v46 }
 0x13a   :  { %v474_v44 = vpack.c.bf16 %v457_v45, %v454_v43  ;;  %v1360_v43 = vld [vmem:[%s1781_s1 + $0x60] sm:$0xff]   ;;  %v671_v45 = vpop.permute.xlu0 %670 }
 0x13c   :  { %524 = vmatprep.subr.bf16.mxu1 %v474_v44 }
 0x13d   :  { %525 = vmatpush1.bf16.msra.mxu1 %v473_v42 }
 0x140   :  { %1180 = vmatmul.mubr.msk.bf16.vlgmr.msra.gmra.mrb[8].mxu1 %vm511_vm1, %v1691_v36 }
 0x141   :  { %560 = vmatprep.mubr.bf16.mxu1 %v1388_v7 }
 0x148   :  { %1181 = vmatmul.mubr.msk.bf16.gmra.mrb[12].mxu1 %vm511_vm1, %v1358_v38 }
 0x149   :  { %718 = vmatprep.mubr.bf16.mxu1 %v1388_v7 }
 0x20b   :  { %v1305_v50 = vpop.f32.mrb[16].mxu0 }
 0x20c   :  { %v614_v51 = vadd.f32 %v1305_v50, %v494_v49  ;;  %v605_v52 = vpop.f32.mrb[17].mxu0 }
 0x20d   :  { %v606_v54 = vadd.f32 %v605_v52, %v484_v47  ;;  %v1306_v55 = vpop.f32.mrb[18].mxu0 }
 0x20e   :  { %v640_v36 = vmul.f32 0.2, %v614_v51  ;;  %v617_v58 = vadd.f32 %v1306_v55, %v499_v53  ;;  %v608_v59 = vpop.f32.mrb[19].mxu0  ;;  %vm628_vm13 = vcmp.gt.f32.partialorder %v614_v51, 0.0 }
 0x20f   :  { %v634_v60 = vmul.f32 0.2, %v606_v54  ;;  %v609_v61 = vadd.f32 %v608_v59, %v489_v48  ;;  %vm622_vm1 = vcmp.gt.f32.partialorder %v606_v54, 0.0 }
 0x210   :  { %vm631_vm14 = vcmp.gt.f32.partialorder %v617_v58, 0.0  ;;  %v643_v62 = vmul.f32 0.2, %v617_v58  ;;  %v652_v0 = vsel %vm628_vm13, %v614_v51, %v640_v36 }
 0x211   :  { %vm625_vm15 = vcmp.gt.f32.partialorder %v609_v61, 0.0  ;;  %v637_v63 = vmul.f32 0.2, %v609_v61  ;;  %v646_v2 = vsel %vm622_vm1, %v606_v54, %v634_v60 }
 0x212   :  { %v655_v1 = vsel %vm631_vm14, %v617_v58, %v643_v62  ;;  %v1361_v58 = vld [vmem:[%s1781_s1 + $0x68] sm:$0xff]  }
 0x213   :  { %v552_v56 = vpop.f32.mrb[8].mxu1  ;;  %v664_v3 = vpack.c.bf16 %v655_v1, %v652_v0  ;;  %v649_v4 = vsel %vm625_vm15, %v609_v61, %v637_v63 }
 0x214   :  { %v553_v5 = vadd.f32 %v552_v56, %v484_v47  ;;  %v554_v6 = vpop.f32.mrb[9].mxu1  ;;  %v661_v8 = vpack.c.bf16 %v649_v4, %v646_v2 }
 0x215   :  { %v555_v9 = vadd.f32 %v554_v6, %v484_v47  ;;  %v556_v10 = vpop.f32.mrb[10].mxu1 }
 0x216   :  { %v632_v11 = vmul.f32 0.2, %v553_v5  ;;  %v557_v12 = vadd.f32 %v556_v10, %v489_v48  ;;  %v558_v13 = vpop.f32.mrb[11].mxu1  ;;  %1308 = vmatpush3.bf16.msra.mxu0 %v661_v8  ;;  %vm620_vm2 = vcmp.gt.f32.partialorder %v553_v5, 0.0 }
 0x217   :  { %v633_v14 = vmul.f32 0.2, %v555_v9  ;;  %v559_v15 = vadd.f32 %v558_v13, %v489_v48  ;;  %vm621_vm3 = vcmp.gt.f32.partialorder %v555_v9, 0.0  ;;  %1309 = vmatprep.subr.bf16.mxu0 %v1389_v46  ;;  %v676_v48 = vpop.permute.xlu1 %675  ;;  %v1756_v13 = vld [vmem:[%s1781_s1 + $0x80] sm:$0xff]  }
 0x218   :  { %vm623_vm4 = vcmp.gt.f32.partialorder %v557_v12, 0.0  ;;  %v635_v16 = vmul.f32 0.2, %v557_v12  ;;  %v644_v19 = vsel %vm620_vm2, %v553_v5, %v632_v11 }
 0x219   :  { %vm624_vm5 = vcmp.gt.f32.partialorder %v559_v15, 0.0  ;;  %v636_v18 = vmul.f32 0.2, %v559_v15  ;;  %v645_v24 = vsel %vm621_vm3, %v555_v9, %v633_v14  ;;  %v804_v14 = vpop.permute.xlu0 %803 }
 0x21a   :  { %v647_v21 = vsel %vm623_vm4, %v557_v12, %v635_v16  ;;  %1310 = vmatpush3.bf16.msra.mxu0 %v664_v3 }
 0x21b   :  { %v659_v22 = vpack.c.bf16 %v647_v21, %v644_v19  ;;  %v562_v23 = vpop.f32.mrb[12].mxu1  ;;  %v648_v25 = vsel %vm624_vm5, %v559_v15, %v636_v18  ;;  %v809_v15 = vpop.permute.xlu1 %808 }
 0x21c   :  { %v563_v26 = vadd.f32 %v562_v23, %v494_v49  ;;  %v564_v27 = vpop.f32.mrb[13].mxu1  ;;  %v660_v28 = vpack.c.bf16 %v648_v25, %v645_v24 }
 0x21d   :  { %v565_v17 = vadd.f32 %v564_v27, %v494_v49  ;;  %v566_v29 = vpop.f32.mrb[14].mxu1  ;;  %1312 = vmatmul.mubr.msk.bf16.vlgmr.msra.gmra.mrb[20].mxu0 %vm164_vm0, %v1359_v57  ;;  %v814_v16 = vpop.permute.xlu0 %813 }
 0x21e   :  { %v638_v30 = vmul.f32 0.2, %v563_v26  ;;  %v567_v31 = vadd.f32 %v566_v29, %v499_v53  ;;  %v568_v32 = vpop.f32.mrb[15].mxu1  ;;  %686 = vmatprep.subr.bf16.mxu1 %v660_v28  ;;  %vm626_vm6 = vcmp.gt.f32.partialorder %v563_v26, 0.0  ;;  %1317 = vmatprep.mubr.msk.bf16.mxu0 %vm831_vm10, %v1360_v43 }
 0x21f   :  { %v639_v33 = vmul.f32 0.2, %v565_v17  ;;  %v569_v34 = vadd.f32 %v568_v32, %v499_v53  ;;  %687 = vmatpush1.bf16.msra.mxu1 %v659_v22  ;;  %vm627_vm7 = vcmp.gt.f32.partialorder %v565_v17, 0.0 }
 0x220   :  { %vm629_vm8 = vcmp.gt.f32.partialorder %v567_v31, 0.0  ;;  %v641_v35 = vmul.f32 0.2, %v567_v31  ;;  %v650_v38 = vsel %vm626_vm6, %v563_v26, %v638_v30 }
 0x221   :  { %vm630_vm9 = vcmp.gt.f32.partialorder %v569_v34, 0.0  ;;  %v642_v37 = vmul.f32 0.2, %v569_v34  ;;  %v651_v40 = vsel %vm627_vm7, %v565_v17, %v639_v33 }
 0x222   :  { %v653_v20 = vsel %vm629_vm8, %v567_v31, %v641_v35 }
 0x223   :  { %v662_v39 = vpack.c.bf16 %v653_v20, %v650_v38  ;;  %v654_v41 = vsel %vm630_vm9, %v569_v34, %v642_v37 }
 0x224   :  { %v663_v42 = vpack.c.bf16 %v654_v41, %v651_v40  ;;  %v1363_v40 = vld [vmem:[%s1781_s1 + $0x88] sm:$0xff]   ;;  %s1391_s1 = smov [#allocation2]  }
 0x225   :  { %s1147_s10 = sshll.u32 %s1391_s1, 4  ;;  %s1148_s10 = int_to_ptr.vmem [resolvable:$true] %s1147_s10 }
 0x226   :  { %688 = vmatprep.subr.bf16.mxu1 %v663_v42  ;;  %s1364_s0 = scalar_lea.vmem %s1148_s10, 1536  ;;  %p1369_p1 = scmp.lt.s32.totalorder %s1148_s10, %s1148_s10 }
 0x227   :  { %689 = vmatpush1.bf16.msra.mxu1 %v662_v39  ;;  %p1365_p0 = scmp.ne.s32.totalorder %s1148_s10, %s1364_s0  ;;  %p1370_p2 = scmp.lt.s32.totalorder %s1364_s0, %s1364_s0 }
 0x229   :  { %p1371_p3 = por %p1370_p2, %p1369_p1 }
 0x22a   :  { %1189 = vmatmul.mubr.msk.bf16.vlgmr.msra.gmra.mrb[16].mxu1 %vm164_vm0, %v1359_v57  ;;  %v819_v57 = vpop.permute.xlu1 %818 }
 0x22b   :  { %870 = vmatprep.mubr.bf16.mxu1 %v1388_v7  ;;  %p1372_p4 = pnand %p1371_p3, %p1365_p0 }
 0x2f0   :  { %v763_v44 = vpop.f32.mrb[20].mxu0 }
 0x2f1   :  { %v764_v46 = vadd.f32 %v763_v44, %v671_v45  ;;  %v1313_v47 = vpop.f32.mrb[21].mxu0 }
 0x2f2   :  { %v766_v49 = vpop.f32.mrb[22].mxu0 }
 0x2f3   :  { %v778_v50 = vmul.f32 0.2, %v764_v46  ;;  %v767_v51 = vadd.f32 %v766_v49, %v676_v48  ;;  %v1314_v52 = vpop.f32.mrb[23].mxu0  ;;  %vm772_vm11 = vcmp.gt.f32.partialorder %v764_v46, 0.0 }
 0x2f5   :  { %vm775_vm12 = vcmp.gt.f32.partialorder %v767_v51, 0.0  ;;  %v781_v53 = vmul.f32 0.2, %v767_v51  ;;  %v784_v54 = vsel %vm772_vm11, %v764_v46, %v778_v50 }
 0x2f7   :  { %v787_v55 = vsel %vm775_vm12, %v767_v51, %v781_v53 }
 0x2f8   :  { %v795_v36 = vpack.c.bf16 %v787_v55, %v784_v54 }
 0x2fa   :  { %1315 = vmatprep.subr.bf16.mxu0 %v795_v36 }
 0x2fb   :  { %1316 = vmatpush3.bf16.msra.mxu0 %v795_v36 }
 0x2fd   :  { %v720_v59 = vpop.f32.mrb[16].mxu1 }
 0x2fe   :  { %v721_v60 = vadd.f32 %v720_v59, %v671_v45  ;;  %v722_v61 = vpop.f32.mrb[17].mxu1  ;;  %1318 = vmatmul.mubr.msk.bf16.vlgmr.msra.gmra.mrb[24].mxu0 %vm831_vm10, %v1361_v58 }
 0x2ff   :  { %v723_v62 = vadd.f32 %v722_v61, %v671_v45  ;;  %v724_v63 = vpop.f32.mrb[18].mxu1  ;;  %1060 = vmatprep.mubr.bf16.mxu0 %v1388_v7 }
 0x300   :  { %v776_v0 = vmul.f32 0.2, %v721_v60  ;;  %v725_v1 = vadd.f32 %v724_v63, %v676_v48  ;;  %v726_v56 = vpop.f32.mrb[19].mxu1  ;;  %vm770_vm13 = vcmp.gt.f32.partialorder %v721_v60, 0.0 }
 0x301   :  { %v777_v2 = vmul.f32 0.2, %v723_v62  ;;  %v727_v3 = vadd.f32 %v726_v56, %v676_v48  ;;  %vm771_vm1 = vcmp.gt.f32.partialorder %v723_v62, 0.0 }
 0x302   :  { %vm773_vm14 = vcmp.gt.f32.partialorder %v725_v1, 0.0  ;;  %v779_v4 = vmul.f32 0.2, %v725_v1  ;;  %v782_v6 = vsel %vm770_vm13, %v721_v60, %v776_v0 }
 0x303   :  { %vm774_vm15 = vcmp.gt.f32.partialorder %v727_v3, 0.0  ;;  %v780_v5 = vmul.f32 0.2, %v727_v3  ;;  %v783_v10 = vsel %vm771_vm1, %v723_v62, %v777_v2 }
 0x304   :  { %v785_v8 = vsel %vm773_vm14, %v725_v1, %v779_v4 }
 0x305   :  { %v793_v9 = vpack.c.bf16 %v785_v8, %v782_v6  ;;  %v786_v11 = vsel %vm774_vm15, %v727_v3, %v780_v5 }
 0x306   :  { %v794_v12 = vpack.c.bf16 %v786_v11, %v783_v10  ;;  %v995_v10 = vpop.permute.xlu0 %994  ;;  %v1000_v11 = vpop.permute.xlu1 %999 }
 0x308   :  { %838 = vmatprep.subr.bf16.mxu1 %v794_v12 }
 0x309   :  { %839 = vmatpush1.bf16.msra.mxu1 %v793_v9 }
 0x30a   :  { %v1005_v12 = vpop.permute.xlu0 %1004 }
 0x30c   :  { %1201 = vmatmul.mubr.msk.bf16.vlgmr.msra.gmra.mrb[20].mxu1 %vm831_vm10, %v1360_v43 }
 0x30d   :  { %880 = vmatprep.mubr.bf16.mxu1 %v1388_v7 }
 0x314   :  { %1202 = vmatmul.mubr.msk.bf16.gmra.mrb[24].mxu1 %vm831_vm10, %v1361_v58 }
 0x315   :  { %1325 = vmatprep.mubr.msk.bf16.mxu1 %vm164_vm0, %v1756_v13 }
 0x3d1   :  { %v1319_v18 = vpop.f32.mrb[24].mxu0 }
 0x3d2   :  { %v934_v19 = vadd.f32 %v1319_v18, %v814_v16  ;;  %v925_v21 = vpop.f32.mrb[25].mxu0  ;;  %v1010_v18 = vpop.permute.xlu1 %1009 }
 0x3d3   :  { %v926_v22 = vadd.f32 %v925_v21, %v804_v14  ;;  %v1320_v23 = vpop.f32.mrb[26].mxu0 }
 0x3d4   :  { %v960_v24 = vmul.f32 0.2, %v934_v19  ;;  %v937_v25 = vadd.f32 %v1320_v23, %v819_v57  ;;  %v928_v26 = vpop.f32.mrb[27].mxu0  ;;  %vm948_vm2 = vcmp.gt.f32.partialorder %v934_v19, 0.0 }
 0x3d5   :  { %v954_v27 = vmul.f32 0.2, %v926_v22  ;;  %v929_v28 = vadd.f32 %v928_v26, %v809_v15  ;;  %vm942_vm3 = vcmp.gt.f32.partialorder %v926_v22, 0.0 }
 0x3d6   :  { %vm951_vm4 = vcmp.gt.f32.partialorder %v937_v25, 0.0  ;;  %v963_v17 = vmul.f32 0.2, %v937_v25  ;;  %v972_v30 = vsel %vm948_vm2, %v934_v19, %v960_v24 }
 0x3d7   :  { %vm945_vm5 = vcmp.gt.f32.partialorder %v929_v28, 0.0  ;;  %v957_v29 = vmul.f32 0.2, %v929_v28  ;;  %v966_v32 = vsel %vm942_vm3, %v926_v22, %v954_v27 }
 0x3d8   :  { %v975_v31 = vsel %vm951_vm4, %v937_v25, %v963_v17 }
 0x3d9   :  { %v969_v33 = vsel %vm945_vm5, %v929_v28, %v957_v29  ;;  %v986_v34 = vpack.c.bf16 %v975_v31, %v972_v30 }
 0x3da   :  { %v983_v35 = vpack.c.bf16 %v969_v33, %v966_v32 }
 0x3dc   :  { %1321 = vmatprep.subr.bf16.mxu1 %v983_v35 }
 0x3dd   :  { %1322 = vmatpush3.bf16.msra.mxu1 %v983_v35 }
 0x3de   :  { %1323 = vmatprep.subr.bf16.mxu1 %v986_v34 }
 0x3df   :  { %v872_v37 = vpop.f32.mrb[20].mxu1 }
 0x3e0   :  { %v873_v38 = vadd.f32 %v872_v37, %v804_v14  ;;  %v874_v20 = vpop.f32.mrb[21].mxu1 }
 0x3e1   :  { %v875_v39 = vadd.f32 %v874_v20, %v804_v14  ;;  %v876_v41 = vpop.f32.mrb[22].mxu1  ;;  %1324 = vmatpush3.bf16.msra.mxu1 %v986_v34 }
 0x3e2   :  { %v952_v42 = vmul.f32 0.2, %v873_v38  ;;  %v877_v43 = vadd.f32 %v876_v41, %v809_v15  ;;  %v878_v45 = vpop.f32.mrb[23].mxu1  ;;  %vm940_vm6 = vcmp.gt.f32.partialorder %v873_v38, 0.0 }
 0x3e3   :  { %v953_v44 = vmul.f32 0.2, %v875_v39  ;;  %v879_v46 = vadd.f32 %v878_v45, %v809_v15  ;;  %vm941_vm7 = vcmp.gt.f32.partialorder %v875_v39, 0.0 }
 0x3e4   :  { %vm943_vm8 = vcmp.gt.f32.partialorder %v877_v43, 0.0  ;;  %v955_v47 = vmul.f32 0.2, %v877_v43  ;;  %1326 = vmatmul.mubr.msk.bf16.vlgmr.msra.gmra.mrb[28].mxu1 %vm164_vm0, %v1363_v40  ;;  %v964_v49 = vsel %vm940_vm6, %v873_v38, %v952_v42 }
 0x3e5   :  { %vm944_vm9 = vcmp.gt.f32.partialorder %v879_v46, 0.0  ;;  %v956_v48 = vmul.f32 0.2, %v879_v46  ;;  %v965_v53 = vsel %vm941_vm7, %v875_v39, %v953_v44 }
 0x3e6   :  { %v967_v50 = vsel %vm943_vm8, %v877_v43, %v955_v47 }
 0x3e7   :  { %v981_v51 = vpack.c.bf16 %v967_v50, %v964_v49  ;;  %v882_v52 = vpop.f32.mrb[24].mxu1  ;;  %v968_v54 = vsel %vm944_vm9, %v879_v46, %v956_v48 }
 0x3e8   :  { %v883_v55 = vadd.f32 %v882_v52, %v814_v16  ;;  %v884_v36 = vpop.f32.mrb[25].mxu1  ;;  %v982_v58 = vpack.c.bf16 %v968_v54, %v965_v53 }
 0x3e9   :  { %v885_v59 = vadd.f32 %v884_v36, %v814_v16  ;;  %v886_v60 = vpop.f32.mrb[26].mxu1 }
 0x3ea   :  { %v958_v61 = vmul.f32 0.2, %v883_v55  ;;  %v887_v62 = vadd.f32 %v886_v60, %v819_v57  ;;  %v888_v63 = vpop.f32.mrb[27].mxu1  ;;  %1028 = vmatprep.subr.bf16.mxu0 %v982_v58  ;;  %vm946_vm10 = vcmp.gt.f32.partialorder %v883_v55, 0.0 }
 0x3eb   :  { %v959_v0 = vmul.f32 0.2, %v885_v59  ;;  %v889_v1 = vadd.f32 %v888_v63, %v819_v57  ;;  %1029 = vmatpush1.bf16.msra.mxu0 %v981_v51  ;;  %vm947_vm11 = vcmp.gt.f32.partialorder %v885_v59, 0.0 }
 0x3ec   :  { %vm949_vm12 = vcmp.gt.f32.partialorder %v887_v62, 0.0  ;;  %v961_v56 = vmul.f32 0.2, %v887_v62  ;;  %v970_v3 = vsel %vm946_vm10, %v883_v55, %v958_v61 }
 0x3ed   :  { %vm950_vm13 = vcmp.gt.f32.partialorder %v889_v1, 0.0  ;;  %v962_v2 = vmul.f32 0.2, %v889_v1  ;;  %v971_v6 = vsel %vm947_vm11, %v885_v59, %v959_v0 }
 0x3ee   :  { %v973_v4 = vsel %vm949_vm12, %v887_v62, %v961_v56 }
 0x3ef   :  { %v984_v5 = vpack.c.bf16 %v973_v4, %v970_v3  ;;  %v974_v8 = vsel %vm950_vm13, %v889_v1, %v962_v2 }
 0x3f0   :  { %v985_v9 = vpack.c.bf16 %v974_v8, %v971_v6 }
 0x3f2   :  { %1030 = vmatprep.subr.bf16.mxu0 %v985_v9 }
 0x3f3   :  { %1031 = vmatpush1.bf16.msra.mxu0 %v984_v5 }
 0x3f6   :  { %1215 = vmatmul.mubr.msk.bf16.vlgmr.msra.gmra.mrb[28].mxu0 %vm164_vm0, %v1756_v13 }
 0x3f7   :  { %1070 = vmatprep.mubr.bf16.mxu0 %v1388_v7 }
 0x3fe   :  { %1216 = vmatmul.mubr.msk.bf16.gmra.mrb[32].mxu0 %vm164_vm0, %v1363_v40 }
 0x4b7   :  { %v1327_v14 = vpop.f32.mrb[28].mxu1 }
 0x4b8   :  { %v1124_v15 = vadd.f32 %v1327_v14, %v1005_v12  ;;  %v1115_v16 = vpop.f32.mrb[29].mxu1 }
 0x4b9   :  { %v1116_v19 = vadd.f32 %v1115_v16, %v995_v10  ;;  %v1328_v21 = vpop.f32.mrb[30].mxu1 }
 0x4ba   :  { %1138 = vst [vmem:[#allocation2 + $0x40] sm:$0xff] %v1124_v15  ;;  %v1127_v57 = vadd.f32 %v1328_v21, %v1010_v18  ;;  %v1118_v22 = vpop.f32.mrb[31].mxu1 }
 0x4bb   :  { %1132 = vst [vmem:[#allocation2 + $0x10] sm:$0xff] %v1116_v19  ;;  %v1119_v23 = vadd.f32 %v1118_v22, %v1000_v11 }
 0x4bc   :  { %1141 = vst [vmem:[#allocation2 + $0x58] sm:$0xff] %v1127_v57 }
 0x4bd   :  { %1135 = vst [vmem:[#allocation2 + $0x28] sm:$0xff] %v1119_v23 }
 0x4c9   :  { %v1062_v13 = vpop.f32.mrb[28].mxu0 }
 0x4ca   :  { %v1063_v7 = vadd.f32 %v1062_v13, %v995_v10  ;;  %v1064_v24 = vpop.f32.mrb[29].mxu0 }
 0x4cb   :  { %v1065_v25 = vadd.f32 %v1064_v24, %v995_v10  ;;  %v1066_v26 = vpop.f32.mrb[30].mxu0 }
 0x4cc   :  { %1130 = vst [vmem:[#allocation2] sm:$0xff] %v1063_v7  ;;  %v1067_v27 = vadd.f32 %v1066_v26, %v1000_v11  ;;  %v1068_v28 = vpop.f32.mrb[31].mxu0 }
 0x4cd   :  { %1131 = vst [vmem:[#allocation2 + $0x8] sm:$0xff] %v1065_v25  ;;  %v1069_v17 = vadd.f32 %v1068_v28, %v1000_v11 }
 0x4ce   :  { %1133 = vst [vmem:[#allocation2 + $0x18] sm:$0xff] %v1067_v27 }
 0x4cf   :  { %1134 = vst [vmem:[#allocation2 + $0x20] sm:$0xff] %v1069_v17 }
 0x4d1   :  { %v1072_v29 = vpop.f32.mrb[32].mxu0 }
 0x4d2   :  { %v1073_v30 = vadd.f32 %v1072_v29, %v1005_v12  ;;  %v1074_v31 = vpop.f32.mrb[33].mxu0 }
 0x4d3   :  { %v1075_v32 = vadd.f32 %v1074_v31, %v1005_v12  ;;  %v1076_v33 = vpop.f32.mrb[34].mxu0 }
 0x4d4   :  { %1136 = vst [vmem:[#allocation2 + $0x30] sm:$0xff] %v1073_v30  ;;  %v1077_v34 = vadd.f32 %v1076_v33, %v1010_v18  ;;  %v1078_v35 = vpop.f32.mrb[35].mxu0 }
 0x4d5   :  { %1137 = vst [vmem:[#allocation2 + $0x38] sm:$0xff] %v1075_v32  ;;  %v1079_v37 = vadd.f32 %v1078_v35, %v1010_v18 }
 0x4d6   :  { %1139 = vst [vmem:[#allocation2 + $0x48] sm:$0xff] %v1077_v34 }
 0x4d7   :  { %1140 = vst [vmem:[#allocation2 + $0x50] sm:$0xff] %v1079_v37 }
 0x4d8   :  { %1375 = shalt.err (!%p1372_p4)
}
 0x4d9   :  { %s1376_s13 = scalar_lea.hbm %s1783_s3, 1536 }
 0x4da   :  { %p1377_p5 = scmp.ne.s32.totalorder %s1783_s3, %s1376_s13  ;;  %p1380_p6 = scmp.lt.u32.totalorder %s1376_s13, %s1783_s3 }
 0x4dc   :  { %p1382_p7 = pnand %p1380_p6, %p1377_p5 }
 0x4de   :  { %1385 = shalt.err (!%p1382_p7)
}
 0x4df   :  { %s1392_s18 = smov 384   ;;  %s1393_s19 = smov 24  }
 0x4e0   :  { %1153 = dma.vmem_to_hbm [thread:$0]  %s1148_s10, 1536, %s1783_s3, [#allocation3], %s1392_s18, %s1392_s18, %s1393_s19  }
 0x4e1   :  { %1386 = dma.done.wait [#allocation3], 1536  }
 0x4e2   :  { %1387 = vsyncadd [#allocation3], 4294965760 }
 0x4e3   :  { %1157 = vsyncpa [#allocation3], 1 }

</bundles_post_ra>
